<compile_context>
chip_gen: v7x
topology: tpu7x:2x2x1
jax: 0.10.0
libtpu: 0.0.40
codegen_flags: <defaults>
</compile_context>

<pallas_src>
import functools
import math

import numpy as np

import jax
import jax.numpy as jnp
from jax import lax
from jax.experimental import pallas as pl
from jax.experimental.pallas import tpu as pltpu


def _has_bf16_eup():
    """bf16 transcendentals (sigmoid/exp) are a win on v6e/v7x; v5e and older
    have no bf16 VPU/EUP so the extra casts would outweigh the savings."""
    try:
        kind = jax.devices()[0].device_kind.lower()
    except Exception:
        return False
    return not any(t in kind for t in ("v2", "v3", "v4", "v5"))


# ----------------------------------------------------------------------------
# Fused kernel: conv-matmul -> RePN -> aGCN (single invocation, all in VMEM)
# ----------------------------------------------------------------------------
def _fused_kernel(p_ref, wc_ref, bc_ref, wrel_ref, wself_ref, wmsg_ref, b2_ref,
                  o_ref, *, n_nodes, bf16_eup):
    M, D = o_ref.shape                      # (128, 32) -- static
    N = n_nodes                             # 64
    B = M // N                              # 2

    # --- backbone: conv as one (B*N, K) @ (K, D) matmul + bias + ReLU --------
    x = jnp.dot(p_ref[...], wc_ref[...], preferred_element_type=jnp.float32)
    x = jnp.maximum(x + bc_ref[...], 0.0)   # (B*N, D) f32 node features
    xb = x.astype(jnp.bfloat16)             # bf16 MXU operands, f32 accumulate

    # --- node-independent projections on the full 128-row slab ---------------
    # W_rel already folds W_phi @ W_psi^T and the 1/sqrt(D) RePN scale.
    t = jnp.dot(xb, wrel_ref[...],
                preferred_element_type=jnp.float32).astype(jnp.bfloat16)
    xmsg = jnp.dot(xb, wmsg_ref[...],
                   preferred_element_type=jnp.float32).astype(jnp.bfloat16)
    # aGCN bias folded in here once (not re-broadcast in the per-batch loop).
    xself = jnp.dot(xb, wself_ref[...],
                    preferred_element_type=jnp.float32) + b2_ref[...]

    # --- per-graph RePN scores + aGCN attention (N x N part) -----------------
    # contract the LAST dims of both operands: t @ x^T without an explicit
    # transpose (no vxpose on the critical path).
    dn = (((1,), (1,)), ((), ()))
    for b in range(B):                      # B = 2, static unroll
        lo, hi = b * N, (b + 1) * N         # 64-row slices: sublane-aligned
        s = lax.dot_general(t[lo:hi], xb[lo:hi], dn,
                            preferred_element_type=jnp.float32)      # (N, N)
        # RePN relatedness + row-softmax.  rel is in (0,1) (sigmoid-bounded),
        # so exp cannot overflow -> max-subtraction dropped on purpose.
        if bf16_eup:
            rel = jax.nn.sigmoid(s.astype(jnp.bfloat16))              # bf16 EUP
            e = jnp.exp(rel).astype(jnp.float32)
        else:
            rel = jax.nn.sigmoid(s)                                   # f32 EUP
            e = jnp.exp(rel)
        inv = pl.reciprocal(jnp.sum(e, axis=-1, keepdims=True), approx=True)
        alpha = (e * inv).astype(jnp.bfloat16)
        msg = jnp.dot(alpha, xmsg[lo:hi],
                      preferred_element_type=jnp.float32)             # (N, D)
        # TODO(synk): on v7x `o_ref[lo:hi] = xself; o_ref[lo:hi] += dot(...)`
        # could hit the MRB in-place accumulate path; kept as one expression
        # since the lowering cannot be verified here without a bundle dump.
        o_ref[lo:hi, :] = jnp.maximum(xself[lo:hi] + msg, 0.0)         # ReLU


# ----------------------------------------------------------------------------
# Wrapper: im2col as pad + one constant-index gather, then the fused kernel
# ----------------------------------------------------------------------------
def _im2col_gather_indices(C, H, W, k, stride, pad):
    """Compile-time constant gather indices into the padded, flattened NCHW
    image.  Feature order matches PyTorch conv weight flattening (c, kh, kw)."""
    Hp, Wp = H + 2 * pad, W + 2 * pad
    Ho = (H + 2 * pad - k) // stride + 1
    Wo = (W + 2 * pad - k) // stride + 1
    idx = np.empty((Ho * Wo, C * k * k), dtype=np.int32)
    for ho in range(Ho):
        for wo in range(Wo):
            n = ho * Wo + wo
            col = 0
            for c in range(C):
                for kh in range(k):
                    for kw in range(k):
                        idx[n, col] = (c * Hp * Wp
                                       + (stride * ho + kh) * Wp
                                       + (stride * wo + kw))
                        col += 1
    return idx, Ho * Wo


def scene_graph_generator(x, params, k=3, stride=2, pad=1):
    B, C, H, W = x.shape
    idx, n_nodes = _im2col_gather_indices(C, H, W, k, stride, pad)
    K = C * k * k
    D = params["conv_w_t"].shape[1]

    # im2col: bf16 cast BEFORE the gather (half the gathered bytes), pad + one
    # constant-index take.  allow_input_fusion below lets XLA pull this producer
    # into the pallas_call operand instead of a separate op + HBM round-trip.
    xp = jnp.pad(x.astype(jnp.bfloat16),
                 ((0, 0), (0, 0), (pad, pad), (pad, pad)))
    patches = jnp.take(xp.reshape(B, -1), jnp.asarray(idx), axis=1)   # (B, N, K)
    patches = patches.reshape(B * n_nodes, K)                         # (128, 36)

    M = B * n_nodes
    flops = (2 * M * K * D                    # conv matmul
             + 3 * 2 * M * D * D              # W_rel / W_msg / W_self projections
             + B * 2 * 2 * n_nodes * n_nodes * D)   # per-graph s and alpha@xmsg
    bytes_accessed = (M * K * 2               # patches (bf16)
                      + K * D * 2 + 3 * D * D * 2   # bf16 weights
                      + 2 * D * 4             # biases
                      + M * D * 4)            # f32 output
    cost = pl.CostEstimate(flops=flops,
                           transcendentals=2 * B * n_nodes * n_nodes,
                           bytes_accessed=bytes_accessed)

    vmem = pl.BlockSpec(memory_space=pltpu.MemorySpace.VMEM)          # whole-array VMEM
    out = pl.pallas_call(
        functools.partial(_fused_kernel, n_nodes=n_nodes,
                          bf16_eup=_has_bf16_eup()),
        out_shape=jax.ShapeDtypeStruct((M, D), jnp.float32),
        in_specs=[vmem] * 7,
        out_specs=vmem,
        compiler_params=pltpu.CompilerParams(
            allow_input_fusion=[True] + [False] * 6),
        cost_estimate=cost,
    )(patches, params["conv_w_t"], params["conv_b"],
      params["w_rel"], params["w_self"], params["w_msg"], params["agcn_b"])
    return out.reshape(B, n_nodes, D)                                 # free reshape


def init_params(key, cin=4, d=32, k=3):
    keys = jax.random.split(key, 7)
    fan_in = cin * k * k
    conv_w = jax.random.normal(keys[0], (d, cin, k, k), jnp.float32) / math.sqrt(fan_in)
    s = 1.0 / math.sqrt(d)
    w_phi = jax.random.normal(keys[2], (d, d), jnp.float32) * s
    w_psi = jax.random.normal(keys[3], (d, d), jnp.float32) * s
    # RePN score matrix collapsed algebraically:
    #   (X Wphi)(X Wpsi)^T / sqrt(d) = X (Wphi Wpsi^T / sqrt(d)) X^T = X W_rel X^T
    # Product and scale computed in f32, cast to bf16 once (MXU operand dtype).
    w_rel = (w_phi @ w_psi.T) * (1.0 / math.sqrt(d))
    return {
        "conv_w_t": conv_w.reshape(d, fan_in).T.astype(jnp.bfloat16),   # (K, D)
        "conv_b": jax.random.normal(keys[1], (1, d), jnp.float32) * 0.01,
        "w_rel": w_rel.astype(jnp.bfloat16),
        "w_self": (jax.random.normal(keys[4], (d, d), jnp.float32) * s).astype(jnp.bfloat16),
        "w_msg": (jax.random.normal(keys[5], (d, d), jnp.float32) * s).astype(jnp.bfloat16),
        "agcn_b": jax.random.normal(keys[6], (1, d), jnp.float32) * 0.01,
    }


if __name__ == "__main__":
    key = jax.random.PRNGKey(0)
    k_x, k_p = jax.random.split(key)
    x = jax.random.normal(k_x, (2, 4, 16, 16), jnp.float32)   # NCHW
    params = init_params(k_p)

    out = jax.jit(scene_graph_generator)(x, params)
    out = jax.block_until_ready(out)
    assert out.shape == (2, 64, 32), out.shape
    assert bool(jnp.all(jnp.isfinite(out)))
    print("KERNEL_OK")
</pallas_src>

<mosaic_0001>
module attributes {stable_mosaic.version = 11 : i64} {
  func.func @_fused_kernel(%arg0: memref<128x36xbf16, #tpu.memory_space<vmem>>, %arg1: memref<36x32xbf16, #tpu.memory_space<vmem>>, %arg2: memref<1x32xf32, #tpu.memory_space<vmem>>, %arg3: memref<32x32xbf16, #tpu.memory_space<vmem>>, %arg4: memref<32x32xbf16, #tpu.memory_space<vmem>>, %arg5: memref<32x32xbf16, #tpu.memory_space<vmem>>, %arg6: memref<1x32xf32, #tpu.memory_space<vmem>>, %arg7: memref<128x32xf32, #tpu.memory_space<vmem>>) attributes {dimension_semantics = [], scalar_prefetch = 0 : i64, scratch_operands = 0 : i64, tpu.core_type = #tpu.core_type<tc>} {
    %c0 = arith.constant 0 : index
    %c0_0 = arith.constant 0 : index
    %0 = vector.load %arg0[%c0, %c0_0] : memref<128x36xbf16, #tpu.memory_space<vmem>>, vector<128x36xbf16>
    %c0_1 = arith.constant 0 : index
    %c0_2 = arith.constant 0 : index
    %1 = vector.load %arg1[%c0_1, %c0_2] : memref<36x32xbf16, #tpu.memory_space<vmem>>, vector<36x32xbf16>
    %cst = arith.constant dense<0.000000e+00> : vector<128x32xf32>
    %2 = tpu.matmul %0, %1, %cst {dimension_numbers = #tpu.dot_dimension_numbers<[1], [0], [0], [1], [0, 0, 1, 1], [], []>} : vector<128x36xbf16>, vector<36x32xbf16>, vector<128x32xf32> -> vector<128x32xf32>
    %c0_3 = arith.constant 0 : index
    %c0_4 = arith.constant 0 : index
    %3 = vector.load %arg2[%c0_3, %c0_4] : memref<1x32xf32, #tpu.memory_space<vmem>>, vector<1x32xf32>
    %4 = vector.broadcast %3 : vector<1x32xf32> to vector<128x32xf32>
    %5 = arith.addf %2, %4 : vector<128x32xf32>
    %cst_5 = arith.constant 0.000000e+00 : f32
    %6 = vector.broadcast %cst_5 : f32 to vector<128x32xf32>
    %7 = arith.maximumf %5, %6 : vector<128x32xf32>
    %8 = arith.truncf %7 : vector<128x32xf32> to vector<128x32xbf16>
    %c0_6 = arith.constant 0 : index
    %c0_7 = arith.constant 0 : index
    %9 = vector.load %arg3[%c0_6, %c0_7] : memref<32x32xbf16, #tpu.memory_space<vmem>>, vector<32x32xbf16>
    %cst_8 = arith.constant dense<0.000000e+00> : vector<128x32xf32>
    %10 = tpu.matmul %8, %9, %cst_8 {dimension_numbers = #tpu.dot_dimension_numbers<[1], [0], [0], [1], [0, 0, 1, 1], [], []>} : vector<128x32xbf16>, vector<32x32xbf16>, vector<128x32xf32> -> vector<128x32xf32>
    %11 = arith.truncf %10 : vector<128x32xf32> to vector<128x32xbf16>
    %c0_9 = arith.constant 0 : index
    %c0_10 = arith.constant 0 : index
    %12 = vector.load %arg5[%c0_9, %c0_10] : memref<32x32xbf16, #tpu.memory_space<vmem>>, vector<32x32xbf16>
    %cst_11 = arith.constant dense<0.000000e+00> : vector<128x32xf32>
    %13 = tpu.matmul %8, %12, %cst_11 {dimension_numbers = #tpu.dot_dimension_numbers<[1], [0], [0], [1], [0, 0, 1, 1], [], []>} : vector<128x32xbf16>, vector<32x32xbf16>, vector<128x32xf32> -> vector<128x32xf32>
    %14 = arith.truncf %13 : vector<128x32xf32> to vector<128x32xbf16>
    %c0_12 = arith.constant 0 : index
    %c0_13 = arith.constant 0 : index
    %15 = vector.load %arg4[%c0_12, %c0_13] : memref<32x32xbf16, #tpu.memory_space<vmem>>, vector<32x32xbf16>
    %cst_14 = arith.constant dense<0.000000e+00> : vector<128x32xf32>
    %16 = tpu.matmul %8, %15, %cst_14 {dimension_numbers = #tpu.dot_dimension_numbers<[1], [0], [0], [1], [0, 0, 1, 1], [], []>} : vector<128x32xbf16>, vector<32x32xbf16>, vector<128x32xf32> -> vector<128x32xf32>
    %c0_15 = arith.constant 0 : index
    %c0_16 = arith.constant 0 : index
    %17 = vector.load %arg6[%c0_15, %c0_16] : memref<1x32xf32, #tpu.memory_space<vmem>>, vector<1x32xf32>
    %18 = vector.broadcast %17 : vector<1x32xf32> to vector<128x32xf32>
    %19 = arith.addf %16, %18 : vector<128x32xf32>
    %20 = vector.extract_strided_slice %11 {offsets = [0, 0], sizes = [64, 32], strides = [1, 1]} : vector<128x32xbf16> to vector<64x32xbf16>
    %21 = vector.extract_strided_slice %8 {offsets = [0, 0], sizes = [64, 32], strides = [1, 1]} : vector<128x32xbf16> to vector<64x32xbf16>
    %cst_17 = arith.constant dense<0.000000e+00> : vector<64x64xf32>
    %22 = tpu.matmul %20, %21, %cst_17 {dimension_numbers = #tpu.dot_dimension_numbers<[1], [1], [0], [0], [0, 0, 1, 0], [], []>} : vector<64x32xbf16>, vector<64x32xbf16>, vector<64x64xf32> -> vector<64x64xf32>
    %23 = arith.truncf %22 : vector<64x64xf32> to vector<64x64xbf16>
    %24 = arith.negf %23 : vector<64x64xbf16>
    %25 = math.exp %24 : vector<64x64xbf16>
    %cst_18 = arith.constant 1.000000e+00 : bf16
    %26 = vector.broadcast %cst_18 : bf16 to vector<64x64xbf16>
    %27 = arith.addf %26, %25 : vector<64x64xbf16>
    %28 = arith.divf %26, %27 : vector<64x64xbf16>
    %29 = math.exp %28 : vector<64x64xbf16>
    %30 = arith.extf %29 : vector<64x64xbf16> to vector<64x64xf32>
    %cst_19 = arith.constant dense<0.000000e+00> : vector<64xf32>
    %31 = vector.multi_reduction <add>, %30, %cst_19 [1] : vector<64x64xf32> to vector<64xf32>
    %32 = vector.shape_cast %31 : vector<64xf32> to vector<64x1xf32>
    %33 = tpu.reciprocal %32 {approx = true} : vector<64x1xf32> -> vector<64x1xf32>
    %34 = vector.broadcast %33 : vector<64x1xf32> to vector<64x64xf32>
    %35 = arith.mulf %30, %34 : vector<64x64xf32>
    %36 = arith.truncf %35 : vector<64x64xf32> to vector<64x64xbf16>
    %37 = vector.extract_strided_slice %14 {offsets = [0, 0], sizes = [64, 32], strides = [1, 1]} : vector<128x32xbf16> to vector<64x32xbf16>
    %cst_20 = arith.constant dense<0.000000e+00> : vector<64x32xf32>
    %38 = tpu.matmul %36, %37, %cst_20 {dimension_numbers = #tpu.dot_dimension_numbers<[1], [0], [0], [1], [0, 0, 1, 1], [], []>} : vector<64x64xbf16>, vector<64x32xbf16>, vector<64x32xf32> -> vector<64x32xf32>
    %39 = vector.extract_strided_slice %19 {offsets = [0, 0], sizes = [64, 32], strides = [1, 1]} : vector<128x32xf32> to vector<64x32xf32>
    %40 = arith.addf %39, %38 : vector<64x32xf32>
    %cst_21 = arith.constant 0.000000e+00 : f32
    %41 = vector.broadcast %cst_21 : f32 to vector<64x32xf32>
    %42 = arith.maximumf %40, %41 : vector<64x32xf32>
    %c0_22 = arith.constant 0 : index
    %c0_23 = arith.constant 0 : index
    %43 = vector.load %arg7[%c0_22, %c0_23] : memref<128x32xf32, #tpu.memory_space<vmem>>, vector<64x32xf32>
    tpu.vector_store %arg7[%c0_22, %c0_23], %42 {strides = array<i32>} : memref<128x32xf32, #tpu.memory_space<vmem>>, vector<64x32xf32>,
    %44 = vector.extract_strided_slice %11 {offsets = [64, 0], sizes = [64, 32], strides = [1, 1]} : vector<128x32xbf16> to vector<64x32xbf16>
    %45 = vector.extract_strided_slice %8 {offsets = [64, 0], sizes = [64, 32], strides = [1, 1]} : vector<128x32xbf16> to vector<64x32xbf16>
    %cst_24 = arith.constant dense<0.000000e+00> : vector<64x64xf32>
    %46 = tpu.matmul %44, %45, %cst_24 {dimension_numbers = #tpu.dot_dimension_numbers<[1], [1], [0], [0], [0, 0, 1, 0], [], []>} : vector<64x32xbf16>, vector<64x32xbf16>, vector<64x64xf32> -> vector<64x64xf32>
    %47 = arith.truncf %46 : vector<64x64xf32> to vector<64x64xbf16>
    %48 = arith.negf %47 : vector<64x64xbf16>
    %49 = math.exp %48 : vector<64x64xbf16>
    %cst_25 = arith.constant 1.000000e+00 : bf16
    %50 = vector.broadcast %cst_25 : bf16 to vector<64x64xbf16>
    %51 = arith.addf %50, %49 : vector<64x64xbf16>
    %52 = arith.divf %50, %51 : vector<64x64xbf16>
    %53 = math.exp %52 : vector<64x64xbf16>
    %54 = arith.extf %53 : vector<64x64xbf16> to vector<64x64xf32>
    %cst_26 = arith.constant dense<0.000000e+00> : vector<64xf32>
    %55 = vector.multi_reduction <add>, %54, %cst_26 [1] : vector<64x64xf32> to vector<64xf32>
    %56 = vector.shape_cast %55 : vector<64xf32> to vector<64x1xf32>
    %57 = tpu.reciprocal %56 {approx = true} : vector<64x1xf32> -> vector<64x1xf32>
    %58 = vector.broadcast %57 : vector<64x1xf32> to vector<64x64xf32>
    %59 = arith.mulf %54, %58 : vector<64x64xf32>
    %60 = arith.truncf %59 : vector<64x64xf32> to vector<64x64xbf16>
    %61 = vector.extract_strided_slice %14 {offsets = [64, 0], sizes = [64, 32], strides = [1, 1]} : vector<128x32xbf16> to vector<64x32xbf16>
    %cst_27 = arith.constant dense<0.000000e+00> : vector<64x32xf32>
    %62 = tpu.matmul %60, %61, %cst_27 {dimension_numbers = #tpu.dot_dimension_numbers<[1], [0], [0], [1], [0, 0, 1, 1], [], []>} : vector<64x64xbf16>, vector<64x32xbf16>, vector<64x32xf32> -> vector<64x32xf32>
    %63 = vector.extract_strided_slice %19 {offsets = [64, 0], sizes = [64, 32], strides = [1, 1]} : vector<128x32xf32> to vector<64x32xf32>
    %64 = arith.addf %63, %62 : vector<64x32xf32>
    %cst_28 = arith.constant 0.000000e+00 : f32
    %65 = vector.broadcast %cst_28 : f32 to vector<64x32xf32>
    %66 = arith.maximumf %64, %65 : vector<64x32xf32>
    %c64 = arith.constant 64 : index
    %c0_29 = arith.constant 0 : index
    %67 = vector.load %arg7[%c64, %c0_29] : memref<128x32xf32, #tpu.memory_space<vmem>>, vector<64x32xf32>
    tpu.vector_store %arg7[%c64, %c0_29], %66 {strides = array<i32>} : memref<128x32xf32, #tpu.memory_space<vmem>>, vector<64x32xf32>,
    return
  }
}

</mosaic_0001>

<bundles_post_ra>
// kernel: scene_graph_generator.1
= control target key start
LH: loop header
LB: loop body
LE: loop exit
PB: predicated region body
PF: predicated region fallthrough
CT: control target
= control target key end

     0   :  { %vm111_vm0 = vcmask 293888   ;;  %vm136_vm1 = vcmask 1041408   ;;  %vm277_vm2 = vcmask 261120   ;;  %vm777_vm3 = vcmask 523264   ;;  %s2032_s1 = inlined_call_operand.vmem [shape: bf16[36,32], index: 1, kind: input, shape index: {}]   ;;  %s2033_s0 = inlined_call_operand.vmem [shape: bf16[128,36], index: 0, kind: input, shape index: {}]   ;;  %s2034_s3 = inlined_call_operand.vmem [shape: bf16[32,32], index: 3, kind: input, shape index: {}]   ;;  %s2035_s4 = inlined_call_operand.vmem [shape: bf16[32,32], index: 4, kind: input, shape index: {}]   ;;  %s2036_s5 = inlined_call_operand.vmem [shape: bf16[32,32], index: 5, kind: input, shape index: {}]   ;;  %s2037_s2 = inlined_call_operand.vmem [shape: f32[1,32], index: 2, kind: input, shape index: {}]   ;;  %s2038_s6 = inlined_call_operand.vmem [shape: f32[1,32], index: 6, kind: input, shape index: {}]   ;;  %s2039_s7 = inlined_call_operand.vmem [shape: f32[128,32], index: 7, kind: output, shape index: {}]  }
   0x1   :  { %v1536_v0 = vld [vmem:[%s2032_s1] sm:$0xff]   ;;  %v1537_v1 = vld [vmem:[%s2032_s1 + $0x8] sm:$0xff]   ;;  %v1538_v2 = vld [vmem:[%s2032_s1 + $0x10] ss:$0 sps:$4 sm:$0x33]  }
   0x2   :  { %1349 = vmatprep.subr.bf16.mxu0 %v1536_v0  ;;  %v1539_v3 = vld [vmem:[%s2033_s0] sm:$0xff]   ;;  %v138_v4 = vsel %vm136_vm1, %v1538_v2, 0  ;;  %v1540_v5 = vld [vmem:[%s2033_s0 + $0x8] sm:$0xff]   ;;  %v1541_v6 = vld [vmem:[%s2033_s0 + $0x10] sm:$0xff]  }
   0x3   :  { %1350 = vmatpush3.bf16.msra.mxu0 %v1536_v0  ;;  %1355 = vmatprep.mubr.msk.bf16.mxu0 %vm111_vm0, %v1539_v3  ;;  %v1542_v7 = vld [vmem:[%s2033_s0 + $0x18] sm:$0xff]   ;;  %v1543_v8 = vld [vmem:[%s2033_s0 + $0x20] sm:$0xff]   ;;  %v1544_v9 = vld [vmem:[%s2033_s0 + $0x28] sm:$0xff]  }
   0x4   :  { %1351 = vmatprep.subr.bf16.mxu0 %v1537_v1  ;;  %v1545_v10 = vld [vmem:[%s2033_s0 + $0x30] sm:$0xff]   ;;  %v1546_v11 = vld [vmem:[%s2033_s0 + $0x38] sm:$0xff]   ;;  %v1547_v12 = vld [vmem:[%s2034_s3] sm:$0xff]  }
   0x5   :  { %v1548_v13 = vld [vmem:[%s2035_s4] sm:$0xff]   ;;  %1371 = vmatprep.subr.bf16.mxu1 %v1547_v12  ;;  %v1549_v14 = vld [vmem:[%s2034_s3 + $0x8] sm:$0xff]  }
   0x6   :  { %1372 = vmatpush3.bf16.msra.mxu1 %v1547_v12  ;;  %v1550_v15 = vld [vmem:[%s2035_s4 + $0x8] sm:$0xff]   ;;  %v1551_v16 = vld [vmem:[%s2036_s5] sm:$0xff]  }
   0x7   :  { %1352 = vmatpush3.bf16.msra.mxu0 %v1537_v1  ;;  %1373 = vmatprep.subr.bf16.mxu1 %v1549_v14  ;;  %v1732_v17 = vld [vmem:[%s2037_s2] ss:$0 sm:$0xff]  ;;  %v1552_v35 = vld [vmem:[%s2036_s5 + $0x8] sm:$0xff]  }
   0x8   :  { %1527 = vmatprep.subr.msk.bf16.mxu0 %vm136_vm1, %v1538_v2 }
   0xa   :  { %1374 = vmatpush3.bf16.msra.mxu1 %v1549_v14 }
   0xb   :  { %1354 = vmatpush3.bf16.msra.mxu0 %v138_v4  ;;  %1391 = vmatprep.subr.bf16.mxu1 %v1551_v16 }
   0xc   :  { %1411 = vmatprep.subr.bf16.mxu0 %v1548_v13 }
   0xe   :  { %1356 = vmatmul.mubr.msk.bf16.vlgmr.msra.gmra.mrb[0].mxu0 %vm111_vm0, %v1540_v5 }
   0xf   :  { %1359 = vmatprep.mubr.msk.bf16.mxu0 %vm111_vm0, %v1541_v6  ;;  %1412 = vmatpush3.bf16.msra.mxu0 %v1548_v13 }
  0x10   :  { %1413 = vmatprep.subr.bf16.mxu0 %v1550_v15 }
  0x13   :  { %1414 = vmatpush3.bf16.msra.mxu0 %v1550_v15 }
  0x16   :  { %1360 = vmatmul.mubr.msk.bf16.gmra.mrb[4].mxu0 %vm111_vm0, %v1542_v7 }
  0x17   :  { %1363 = vmatprep.mubr.msk.bf16.mxu0 %vm111_vm0, %v1543_v8 }
  0x1e   :  { %1364 = vmatmul.mubr.msk.bf16.gmra.mrb[8].mxu0 %vm111_vm0, %v1544_v9 }
  0x1f   :  { %1367 = vmatprep.mubr.msk.bf16.mxu0 %vm111_vm0, %v1545_v10 }
  0x26   :  { %1368 = vmatmul.mubr.msk.bf16.gmra.mrb[12].mxu0 %vm111_vm0, %v1546_v11 }
  0xe1   :  { %v1357_v18 = vpop.f32.mrb[0].mxu0 }
  0xe2   :  { %v183_v19 = vadd.f32 %v1357_v18, %v1732_v17  ;;  %v174_v20 = vpop.f32.mrb[1].mxu0 }
  0xe3   :  { %v175_v21 = vadd.f32 %v1732_v17, %v174_v20  ;;  %v1358_v22 = vpop.f32.mrb[2].mxu0 }
  0xe4   :  { %v186_v23 = vadd.f32 %v1358_v22, %v1732_v17  ;;  %v177_v24 = vpop.f32.mrb[3].mxu0  ;;  %v239_v26 = vmax.f32 %v183_v19, 0.0 }
  0xe5   :  { %v178_v25 = vadd.f32 %v1732_v17, %v177_v24  ;;  %v237_v28 = vmax.f32 %v175_v21, 0.0 }
  0xe6   :  { %v240_v27 = vmax.f32 %v186_v23, 0.0 }
  0xe7   :  { %v238_v29 = vmax.f32 %v178_v25, 0.0 }
  0xe8   :  { %v1738_v30 = vpack.c.bf16 %v240_v27, %v239_v26 }
  0xe9   :  { %v1740_v31 = vpack.c.bf16 %v238_v29, %v237_v28  ;;  %v1361_v32 = vpop.f32.mrb[4].mxu0 }
  0xea   :  { %v199_v33 = vadd.f32 %v1361_v32, %v1732_v17  ;;  %v190_v34 = vpop.f32.mrb[5].mxu0  ;;  %v282_v12 = vsel %vm277_vm2, %v1738_v30, 0 }
  0xeb   :  { %v191_v36 = vadd.f32 %v1732_v17, %v190_v34  ;;  %v1362_v37 = vpop.f32.mrb[6].mxu0  ;;  %1375 = vmatprep.mubr.msk.bf16.mxu1 %vm277_vm2, %v1740_v31  ;;  %1415 = vmatprep.mubr.msk.bf16.mxu0 %vm277_vm2, %v1740_v31  ;;  %v279_v11 = vsel %vm277_vm2, %v1740_v31, 0 }
  0xec   :  { %v243_v38 = vmax.f32 %v199_v33, 0.0  ;;  %v202_v39 = vadd.f32 %v1362_v37, %v1732_v17  ;;  %v193_v40 = vpop.f32.mrb[7].mxu0  ;;  %1376 = vmatmul.mubr.msk.bf16.vlgmr.msra.gmra.mrb[0].mxu1 %vm277_vm2, %v1738_v30  ;;  %1416 = vmatmul.mubr.msk.bf16.vlgmr.msra.gmra.mrb[16].mxu0 %vm277_vm2, %v1738_v30 }
  0xed   :  { %v241_v41 = vmax.f32 %v191_v36, 0.0  ;;  %v194_v42 = vadd.f32 %v1732_v17, %v193_v40  ;;  %1392 = vmatpush3.bf16.msra.mxu1 %v1551_v16 }
  0xee   :  { %v244_v43 = vmax.f32 %v202_v39, 0.0  ;;  %1393 = vmatprep.subr.bf16.mxu1 %v1552_v35 }
  0xef   :  { %v242_v44 = vmax.f32 %v194_v42, 0.0 }
  0xf0   :  { %v256_v45 = vpack.c.bf16 %v244_v43, %v243_v38 }
  0xf1   :  { %v255_v46 = vpack.c.bf16 %v242_v44, %v241_v41  ;;  %1394 = vmatpush3.bf16.msra.mxu1 %v1552_v35  ;;  %v1365_v47 = vpop.f32.mrb[8].mxu0 }
  0xf2   :  { %v215_v48 = vadd.f32 %v1365_v47, %v1732_v17  ;;  %1528 = vmatprep.subr.msk.bf16.mxu1 %vm277_vm2, %v1740_v31  ;;  %v206_v49 = vpop.f32.mrb[9].mxu0  ;;  %v288_v14 = vsel %vm277_vm2, %v256_v45, 0 }
  0xf3   :  { %v207_v50 = vadd.f32 %v1732_v17, %v206_v49  ;;  %v1366_v51 = vpop.f32.mrb[10].mxu0  ;;  %1379 = vmatprep.mubr.msk.bf16.mxu1 %vm277_vm2, %v255_v46  ;;  %1419 = vmatprep.mubr.msk.bf16.mxu0 %vm277_vm2, %v255_v46  ;;  %v285_v13 = vsel %vm277_vm2, %v255_v46, 0 }
  0xf4   :  { %v247_v52 = vmax.f32 %v215_v48, 0.0  ;;  %v218_v53 = vadd.f32 %v1366_v51, %v1732_v17  ;;  %v209_v54 = vpop.f32.mrb[11].mxu0  ;;  %1380 = vmatmul.mubr.msk.bf16.gmra.mrb[4].mxu1 %vm277_vm2, %v256_v45  ;;  %1420 = vmatmul.mubr.msk.bf16.gmra.mrb[20].mxu0 %vm277_vm2, %v256_v45 }
  0xf5   :  { %v245_v55 = vmax.f32 %v207_v50, 0.0  ;;  %v210_v56 = vadd.f32 %v1732_v17, %v209_v54 }
  0xf6   :  { %v248_v57 = vmax.f32 %v218_v53, 0.0 }
  0xf7   :  { %v246_v58 = vmax.f32 %v210_v56, 0.0 }
  0xf8   :  { %v1767_v59 = vpack.c.bf16 %v248_v57, %v247_v52 }
  0xf9   :  { %v257_v60 = vpack.c.bf16 %v246_v58, %v245_v55  ;;  %v1369_v61 = vpop.f32.mrb[12].mxu0 }
  0xfa   :  { %v231_v62 = vadd.f32 %v1369_v61, %v1732_v17  ;;  %v222_v63 = vpop.f32.mrb[13].mxu0  ;;  %v294_v28 = vsel %vm277_vm2, %v1767_v59, 0 }
  0xfb   :  { %v223_v0 = vadd.f32 %v1732_v17, %v222_v63  ;;  %v1370_v1 = vpop.f32.mrb[14].mxu0  ;;  %1383 = vmatprep.mubr.msk.bf16.mxu1 %vm277_vm2, %v257_v60  ;;  %1423 = vmatprep.mubr.msk.bf16.mxu0 %vm277_vm2, %v257_v60  ;;  %v291_v21 = vsel %vm277_vm2, %v257_v60, 0 }
  0xfc   :  { %v251_v2 = vmax.f32 %v231_v62, 0.0  ;;  %v234_v3 = vadd.f32 %v1370_v1, %v1732_v17  ;;  %v225_v4 = vpop.f32.mrb[15].mxu0  ;;  %1384 = vmatmul.mubr.msk.bf16.gmra.mrb[8].mxu1 %vm277_vm2, %v1767_v59  ;;  %1424 = vmatmul.mubr.msk.bf16.gmra.mrb[24].mxu0 %vm277_vm2, %v1767_v59 }
  0xfd   :  { %v249_v5 = vmax.f32 %v223_v0, 0.0  ;;  %v226_v6 = vadd.f32 %v1732_v17, %v225_v4 }
  0xfe   :  { %v252_v7 = vmax.f32 %v234_v3, 0.0 }
  0xff   :  { %v250_v8 = vmax.f32 %v226_v6, 0.0 }
 0x100   :  { %v1779_v9 = vpack.c.bf16 %v252_v7, %v251_v2 }
 0x101   :  { %v259_v10 = vpack.c.bf16 %v250_v8, %v249_v5 }
 0x102   :  { %v300_v42 = vsel %vm277_vm2, %v1779_v9, 0 }
 0x103   :  { %1387 = vmatprep.mubr.msk.bf16.mxu1 %vm277_vm2, %v259_v10  ;;  %1427 = vmatprep.mubr.msk.bf16.mxu0 %vm277_vm2, %v259_v10  ;;  %v297_v35 = vsel %vm277_vm2, %v259_v10, 0 }
 0x104   :  { %1388 = vmatmul.mubr.msk.bf16.gmra.mrb[12].mxu1 %vm277_vm2, %v1779_v9  ;;  %1428 = vmatmul.mubr.msk.bf16.gmra.mrb[28].mxu0 %vm277_vm2, %v1779_v9 }
 0x105   :  { %1395 = vmatprep.mubr.msk.bf16.mxu1 %vm277_vm2, %v1740_v31 }
 0x10c   :  { %1396 = vmatmul.mubr.msk.bf16.vlgmr.msra.gmra.mrb[16].mxu1 %vm277_vm2, %v1738_v30 }
 0x10d   :  { %1432 = vmatpush3.bf16.xpose.msra.mxu1 %v279_v11  ;;  %1399 = vmatprep.mubr.msk.bf16.mxu1 %vm277_vm2, %v255_v46 }
 0x10e   :  { %1529 = vmatprep.subr.msk.bf16.mxu1 %vm277_vm2, %v1738_v30 }
 0x114   :  { %1400 = vmatmul.mubr.msk.bf16.gmra.mrb[20].mxu1 %vm277_vm2, %v256_v45 }
 0x115   :  { %1434 = vmatpush3.bf16.xpose.msra.mxu1 %v282_v12  ;;  %1403 = vmatprep.mubr.msk.bf16.mxu1 %vm277_vm2, %v257_v60 }
 0x116   :  { %1530 = vmatprep.subr.msk.bf16.mxu1 %vm277_vm2, %v255_v46 }
 0x11c   :  { %1404 = vmatmul.mubr.msk.bf16.gmra.mrb[24].mxu1 %vm277_vm2, %v1767_v59 }
 0x11d   :  { %1436 = vmatpush3.bf16.xpose.msra.mxu1 %v285_v13  ;;  %1407 = vmatprep.mubr.msk.bf16.mxu1 %vm277_vm2, %v259_v10 }
 0x11e   :  { %1531 = vmatprep.subr.msk.bf16.mxu1 %vm277_vm2, %v256_v45 }
 0x124   :  { %1408 = vmatmul.mubr.msk.bf16.gmra.mrb[28].mxu1 %vm277_vm2, %v1779_v9 }
 0x125   :  { %1438 = vmatpush3.bf16.xpose.msra.mxu1 %v288_v14 }
 0x126   :  { %1532 = vmatprep.subr.msk.bf16.mxu1 %vm277_vm2, %v257_v60 }
 0x1bf   :  { %v1377_v15 = vpop.f32.mrb[0].mxu1 }
 0x1c0   :  { %v336_v16 = vpop.f32.mrb[1].mxu1 }
 0x1c1   :  { %v1378_v17 = vpop.f32.mrb[2].mxu1 }
 0x1c2   :  { %v400_v18 = vpack.c.bf16 %v1378_v17, %v1377_v15  ;;  %v339_v19 = vpop.f32.mrb[3].mxu1 }
 0x1c3   :  { %v399_v20 = vpack.c.bf16 %v339_v19, %v336_v16 }
 0x1c5   :  { %1439 = vmatprep.mubr.msk.bf16.mxu1 %vm277_vm2, %v399_v20 }
 0x1c6   :  { %1440 = vmatmul.mubr.msk.bf16.vlgmr.msra.gmra.mrb[32].mxu1 %vm277_vm2, %v400_v18 }
 0x1c7   :  { %1464 = vmatpush3.bf16.xpose.msra.mxu1 %v291_v21  ;;  %v1381_v22 = vpop.f32.mrb[4].mxu1 }
 0x1c8   :  { %1533 = vmatprep.subr.msk.bf16.mxu1 %vm277_vm2, %v1767_v59  ;;  %v352_v23 = vpop.f32.mrb[5].mxu1 }
 0x1c9   :  { %v1382_v24 = vpop.f32.mrb[6].mxu1 }
 0x1ca   :  { %v402_v25 = vpack.c.bf16 %v1382_v24, %v1381_v22  ;;  %v355_v26 = vpop.f32.mrb[7].mxu1 }
 0x1cb   :  { %v401_v27 = vpack.c.bf16 %v355_v26, %v352_v23 }
 0x1cd   :  { %1443 = vmatprep.mubr.msk.bf16.mxu1 %vm277_vm2, %v401_v27 }
 0x1ce   :  { %1444 = vmatmul.mubr.msk.bf16.gmra.mrb[36].mxu1 %vm277_vm2, %v402_v25 }
 0x1cf   :  { %1466 = vmatpush3.bf16.xpose.msra.mxu1 %v294_v28  ;;  %v1385_v29 = vpop.f32.mrb[8].mxu1 }
 0x1d0   :  { %1534 = vmatprep.subr.msk.bf16.mxu1 %vm277_vm2, %v259_v10  ;;  %v368_v30 = vpop.f32.mrb[9].mxu1 }
 0x1d1   :  { %v1386_v31 = vpop.f32.mrb[10].mxu1 }
 0x1d2   :  { %v404_v32 = vpack.c.bf16 %v1386_v31, %v1385_v29  ;;  %v371_v33 = vpop.f32.mrb[11].mxu1 }
 0x1d3   :  { %v403_v34 = vpack.c.bf16 %v371_v33, %v368_v30 }
 0x1d5   :  { %1471 = vmatprep.mubr.msk.bf16.mxu1 %vm277_vm2, %v403_v34 }
 0x1d7   :  { %1468 = vmatpush3.bf16.xpose.msra.mxu1 %v297_v35  ;;  %v1389_v36 = vpop.f32.mrb[12].mxu1 }
 0x1d8   :  { %1535 = vmatprep.subr.msk.bf16.mxu1 %vm277_vm2, %v1779_v9  ;;  %v384_v37 = vpop.f32.mrb[13].mxu1 }
 0x1d9   :  { %v1390_v38 = vpop.f32.mrb[14].mxu1 }
 0x1da   :  { %v406_v39 = vpack.c.bf16 %v1390_v38, %v1389_v36  ;;  %v387_v40 = vpop.f32.mrb[15].mxu1 }
 0x1db   :  { %v405_v41 = vpack.c.bf16 %v387_v40, %v384_v37 }
 0x1df   :  { %1470 = vmatpush3.bf16.xpose.msra.mxu1 %v300_v42  ;;  %v1397_v43 = vpop.f32.mrb[16].mxu1 }
 0x1e0   :  { %v457_v44 = vpop.f32.mrb[17].mxu1 }
 0x1e1   :  { %v1398_v45 = vpop.f32.mrb[18].mxu1 }
 0x1e2   :  { %v521_v46 = vpack.c.bf16 %v1398_v45, %v1397_v43  ;;  %v460_v47 = vpop.f32.mrb[19].mxu1 }
 0x1e3   :  { %v520_v48 = vpack.c.bf16 %v460_v47, %v457_v44 }
 0x1e5   :  { %1447 = vmatprep.subr.bf16.mxu0 %v520_v48 }
 0x1e6   :  { %1472 = vmatmul.mubr.msk.bf16.vlgmr.msra.gmra.mrb[40].mxu1 %vm277_vm2, %v404_v32  ;;  %1448 = vmatpush3.bf16.msra.mxu0 %v520_v48 }
 0x1e7   :  { %1475 = vmatprep.mubr.msk.bf16.mxu1 %vm277_vm2, %v405_v41  ;;  %v1401_v49 = vpop.f32.mrb[20].mxu1  ;;  %1449 = vmatprep.subr.bf16.mxu0 %v521_v46 }
 0x1e8   :  { %v473_v50 = vpop.f32.mrb[21].mxu1 }
 0x1e9   :  { %v1402_v51 = vpop.f32.mrb[22].mxu1 }
 0x1ea   :  { %v523_v52 = vpack.c.bf16 %v1402_v51, %v1401_v49  ;;  %v476_v53 = vpop.f32.mrb[23].mxu1  ;;  %1450 = vmatpush3.bf16.msra.mxu0 %v521_v46 }
 0x1eb   :  { %v522_v54 = vpack.c.bf16 %v476_v53, %v473_v50 }
 0x1ed   :  { %1451 = vmatprep.subr.bf16.mxu0 %v522_v54 }
 0x1ee   :  { %1476 = vmatmul.mubr.msk.bf16.gmra.mrb[44].mxu1 %vm277_vm2, %v406_v39  ;;  %1452 = vmatpush3.bf16.msra.mxu0 %v522_v54 }
 0x1ef   :  { %v1405_v55 = vpop.f32.mrb[24].mxu1  ;;  %1453 = vmatprep.subr.bf16.mxu0 %v523_v52 }
 0x1f0   :  { %v489_v56 = vpop.f32.mrb[25].mxu1 }
 0x1f1   :  { %v1406_v57 = vpop.f32.mrb[26].mxu1 }
 0x1f2   :  { %v1829_v58 = vpack.c.bf16 %v1406_v57, %v1405_v55  ;;  %v492_v59 = vpop.f32.mrb[27].mxu1  ;;  %1454 = vmatpush3.bf16.msra.mxu0 %v523_v52 }
 0x1f3   :  { %v1831_v60 = vpack.c.bf16 %v492_v59, %v489_v56 }
 0x1f5   :  { %1479 = vmatprep.subr.bf16.mxu0 %v1831_v60 }
 0x1f7   :  { %v1409_v61 = vpop.f32.mrb[28].mxu1 }
 0x1f8   :  { %v505_v62 = vpop.f32.mrb[29].mxu1 }
 0x1f9   :  { %v1410_v63 = vpop.f32.mrb[30].mxu1 }
 0x1fa   :  { %v1834_v0 = vpack.c.bf16 %v1410_v63, %v1409_v61  ;;  %v508_v1 = vpop.f32.mrb[31].mxu1 }
 0x1fb   :  { %v1836_v2 = vpack.c.bf16 %v508_v1, %v505_v62 }
 0x299   :  { %v1441_v3 = vpop.f32.mrb[32].mxu1 }
 0x29a   :  { %v694_v4 = vpop.f32.mrb[33].mxu1 }
 0x29b   :  { %v1442_v5 = vpop.f32.mrb[34].mxu1 }
 0x29c   :  { %v726_v6 = vpack.c.bf16 %v1442_v5, %v1441_v3  ;;  %v697_v7 = vpop.f32.mrb[35].mxu1 }
 0x29d   :  { %v725_v8 = vpack.c.bf16 %v697_v7, %v694_v4 }
 0x29e   :  { %v1257_v9 = vmul.bf16 3216621497, %v726_v6 }
 0x29f   :  { %v1256_v10 = vmul.bf16 3216621497, %v725_v8 }
 0x2a0   :  { %1553 = vpow.bf16 %v1257_v9 }
 0x2a1   :  { %1555 = vpow.bf16 %v1256_v10  ;;  %v1445_v11 = vpop.f32.mrb[36].mxu1 }
 0x2a2   :  { %v710_v12 = vpop.f32.mrb[37].mxu1 }
 0x2a3   :  { %v1446_v13 = vpop.f32.mrb[38].mxu1 }
 0x2a4   :  { %v728_v14 = vpack.c.bf16 %v1446_v13, %v1445_v11  ;;  %v713_v15 = vpop.f32.mrb[39].mxu1 }
 0x2a5   :  { %v727_v16 = vpack.c.bf16 %v713_v15, %v710_v12 }
 0x2a6   :  { %v1259_v17 = vmul.bf16 3216621497, %v728_v14 }
 0x2a7   :  { %v1258_v18 = vmul.bf16 3216621497, %v727_v16 }
 0x2a8   :  { %1557 = vpow.bf16 %v1259_v17 }
 0x2a9   :  { %1559 = vpow.bf16 %v1258_v18 }
 0x2ab   :  { %v1554_v19 = vpop.eup %1553 }
 0x2ac   :  { %v1556_v20 = vpop.eup %1555  ;;  %v746_v21 = vadd.bf16 1065369472, %v1554_v19 }
 0x2ad   :  { %v745_v22 = vadd.bf16 1065369472, %v1556_v20 }
 0x2ae   :  { %1561 = vrcp.bf16 %v746_v21 }
 0x2af   :  { %1563 = vrcp.bf16 %v745_v22 }
 0x2b3   :  { %v1558_v23 = vpop.eup %1557 }
 0x2b4   :  { %v1560_v24 = vpop.eup %1559  ;;  %v748_v25 = vadd.bf16 1065369472, %v1558_v23 }
 0x2b5   :  { %v747_v26 = vadd.bf16 1065369472, %v1560_v24 }
 0x2b6   :  { %1565 = vrcp.bf16 %v748_v25 }
 0x2b7   :  { %1567 = vrcp.bf16 %v747_v26 }
 0x2b9   :  { %v1562_v27 = vpop.eup %1561  ;;  %v1473_v28 = vpop.f32.mrb[40].mxu1 }
 0x2ba   :  { %v1564_v29 = vpop.eup %1563  ;;  %v752_v30 = vmul.bf16 1065369472, %v1562_v27  ;;  %v969_v31 = vpop.f32.mrb[41].mxu1 }
 0x2bb   :  { %v750_v32 = vmul.bf16 1065369472, %v1564_v29  ;;  %v1474_v33 = vpop.f32.mrb[42].mxu1 }
 0x2bc   :  { %v761_v34 = vmul.bf16 1069105081, %v752_v30  ;;  %v1001_v35 = vpack.c.bf16 %v1474_v33, %v1473_v28  ;;  %v972_v36 = vpop.f32.mrb[43].mxu1 }
 0x2bd   :  { %v758_v37 = vmul.bf16 1069105081, %v750_v32  ;;  %v1000_v38 = vpack.c.bf16 %v972_v36, %v969_v31 }
 0x2be   :  { %1569 = vpow.bf16 %v761_v34  ;;  %v1269_v39 = vmul.bf16 3216621497, %v1001_v35 }
 0x2bf   :  { %1571 = vpow.bf16 %v758_v37  ;;  %v1268_v40 = vmul.bf16 3216621497, %v1000_v38 }
 0x2c0   :  { %1573 = vpow.bf16 %v1269_v39 }
 0x2c1   :  { %v1566_v41 = vpop.eup %1565  ;;  %1575 = vpow.bf16 %v1268_v40  ;;  %v1477_v42 = vpop.f32.mrb[44].mxu1 }
 0x2c2   :  { %v1568_v43 = vpop.eup %1567  ;;  %v756_v44 = vmul.bf16 1065369472, %v1566_v41  ;;  %v985_v45 = vpop.f32.mrb[45].mxu1 }
 0x2c3   :  { %v754_v46 = vmul.bf16 1065369472, %v1568_v43  ;;  %v1478_v47 = vpop.f32.mrb[46].mxu1 }
 0x2c4   :  { %v767_v48 = vmul.bf16 1069105081, %v756_v44  ;;  %v1003_v49 = vpack.c.bf16 %v1478_v47, %v1477_v42  ;;  %v988_v50 = vpop.f32.mrb[47].mxu1 }
 0x2c5   :  { %v764_v51 = vmul.bf16 1069105081, %v754_v46  ;;  %v1002_v52 = vpack.c.bf16 %v988_v50, %v985_v45 }
 0x2c6   :  { %1577 = vpow.bf16 %v767_v48  ;;  %v1271_v53 = vmul.bf16 3216621497, %v1003_v49 }
 0x2c7   :  { %1579 = vpow.bf16 %v764_v51  ;;  %v1270_v54 = vmul.bf16 3216621497, %v1002_v52 }
 0x2c8   :  { %1581 = vpow.bf16 %v1271_v53 }
 0x2c9   :  { %v1838_v55 = vpop.eup %1569  ;;  %1583 = vpow.bf16 %v1270_v54 }
 0x2ca   :  { %v1840_v56 = vpop.eup %1571  ;;  %v771_v57 = vunpack.c.l.bf16 %v1838_v55  ;;  %v772_v3 = vunpack.c.h.bf16 %v1838_v55 }
 0x2cb   :  { %v1574_v59 = vpop.eup %1573  ;;  %v769_v61 = vunpack.c.l.bf16 %v1840_v56  ;;  %v770_v6 = vunpack.c.h.bf16 %v1840_v56 }
 0x2cc   :  { %v1576_v62 = vpop.eup %1575  ;;  %v1021_v63 = vadd.bf16 1065369472, %v1574_v59  ;;  %v784_v1 = vsel %vm777_vm3, %v771_v57, 0.0  ;;  %v787_v7 = vsel %vm777_vm3, %v772_v3, 0.0 }
 0x2cd   :  { %v1020_v4 = vadd.bf16 1065369472, %v1576_v62  ;;  %785 = vadd.xlane.f32.xlu1 %v784_v1  ;;  %v778_v5 = vsel %vm777_vm3, %v769_v61, 0.0  ;;  %v781_v9 = vsel %vm777_vm3, %v770_v6, 0.0 }
 0x2ce   :  { %1585 = vrcp.bf16 %v1021_v63  ;;  %779 = vadd.xlane.f32.xlu0 %v778_v5 }
 0x2cf   :  { %1587 = vrcp.bf16 %v1020_v4 }
 0x2d1   :  { %v1855_v8 = vpop.eup %1577  ;;  %788 = vadd.xlane.f32.xlu1 %v787_v7 }
 0x2d2   :  { %v1860_v10 = vpop.eup %1579  ;;  %782 = vadd.xlane.f32.xlu0 %v781_v9  ;;  %v776_v14 = vunpack.c.h.bf16 %v1855_v8  ;;  %v775_v15 = vunpack.c.l.bf16 %v1855_v8 }
 0x2d3   :  { %v1582_v11 = vpop.eup %1581  ;;  %v774_v12 = vunpack.c.h.bf16 %v1860_v10  ;;  %v773_v13 = vunpack.c.l.bf16 %v1860_v10 }
 0x2d4   :  { %v1584_v16 = vpop.eup %1583  ;;  %v1023_v17 = vadd.bf16 1065369472, %v1582_v11  ;;  %v799_v21 = vsel %vm777_vm3, %v776_v14, 0.0  ;;  %v796_v22 = vsel %vm777_vm3, %v775_v15, 0.0 }
 0x2d5   :  { %v1022_v18 = vadd.bf16 1065369472, %v1584_v16  ;;  %v793_v19 = vsel %vm777_vm3, %v774_v12, 0.0  ;;  %v790_v20 = vsel %vm777_vm3, %v773_v13, 0.0 }
 0x2d6   :  { %1589 = vrcp.bf16 %v1023_v17  ;;  %794 = vadd.xlane.f32.xlu1 %v793_v19  ;;  %791 = vadd.xlane.f32.xlu0 %v790_v20 }
 0x2d7   :  { %1591 = vrcp.bf16 %v1022_v18 }
 0x2d9   :  { %v1586_v23 = vpop.eup %1585 }
 0x2da   :  { %v1588_v24 = vpop.eup %1587  ;;  %v1027_v25 = vmul.bf16 1065369472, %v1586_v23  ;;  %800 = vadd.xlane.f32.xlu1 %v799_v21  ;;  %797 = vadd.xlane.f32.xlu0 %v796_v22 }
 0x2db   :  { %v1025_v26 = vmul.bf16 1065369472, %v1588_v24 }
 0x2dc   :  { %v1036_v27 = vmul.bf16 1069105081, %v1027_v25 }
 0x2dd   :  { %v1033_v28 = vmul.bf16 1069105081, %v1025_v26 }
 0x2de   :  { %1593 = vpow.bf16 %v1036_v27 }
 0x2df   :  { %1595 = vpow.bf16 %v1033_v28 }
 0x2e1   :  { %v1590_v29 = vpop.eup %1589 }
 0x2e2   :  { %v1592_v30 = vpop.eup %1591  ;;  %v1031_v31 = vmul.bf16 1065369472, %v1590_v29 }
 0x2e3   :  { %v1029_v32 = vmul.bf16 1065369472, %v1592_v30 }
 0x2e4   :  { %v1042_v33 = vmul.bf16 1069105081, %v1031_v31 }
 0x2e5   :  { %v1039_v34 = vmul.bf16 1069105081, %v1029_v32 }
 0x2e6   :  { %1597 = vpow.bf16 %v1042_v33 }
 0x2e7   :  { %1599 = vpow.bf16 %v1039_v34 }
 0x2e9   :  { %v1878_v35 = vpop.eup %1593 }
 0x2ea   :  { %v1880_v36 = vpop.eup %1595  ;;  %v1047_v41 = vunpack.c.h.bf16 %v1878_v35  ;;  %v1046_v42 = vunpack.c.l.bf16 %v1878_v35 }
 0x2eb   :  { %v1045_v37 = vunpack.c.h.bf16 %v1880_v36  ;;  %v1044_v38 = vunpack.c.l.bf16 %v1880_v36 }
 0x2ec   :  { %v1061_v44 = vsel %vm777_vm3, %v1047_v41, 0.0  ;;  %v1058_v45 = vsel %vm777_vm3, %v1046_v42, 0.0 }
 0x2ed   :  { %v1055_v39 = vsel %vm777_vm3, %v1045_v37, 0.0  ;;  %v1052_v40 = vsel %vm777_vm3, %v1044_v38, 0.0 }
 0x2ee   :  { %1056 = vadd.xlane.f32.xlu1 %v1055_v39  ;;  %1053 = vadd.xlane.f32.xlu0 %v1052_v40 }
 0x2f1   :  { %v1892_v43 = vpop.eup %1597 }
 0x2f2   :  { %v1900_v46 = vpop.eup %1599  ;;  %1062 = vadd.xlane.f32.xlu1 %v1061_v44  ;;  %1059 = vadd.xlane.f32.xlu0 %v1058_v45  ;;  %v1051_v51 = vunpack.c.h.bf16 %v1892_v43  ;;  %v1050_v52 = vunpack.c.l.bf16 %v1892_v43 }
 0x2f3   :  { %v1049_v47 = vunpack.c.h.bf16 %v1900_v46  ;;  %v1048_v48 = vunpack.c.l.bf16 %v1900_v46 }
 0x2f4   :  { %v1073_v53 = vsel %vm777_vm3, %v1051_v51, 0.0  ;;  %v1070_v54 = vsel %vm777_vm3, %v1050_v52, 0.0 }
 0x2f5   :  { %v1067_v49 = vsel %vm777_vm3, %v1049_v47, 0.0  ;;  %v1064_v50 = vsel %vm777_vm3, %v1048_v48, 0.0 }
 0x2f6   :  { %1068 = vadd.xlane.f32.xlu1 %v1067_v49  ;;  %1065 = vadd.xlane.f32.xlu0 %v1064_v50 }
 0x2fa   :  { %1074 = vadd.xlane.f32.xlu1 %v1073_v53  ;;  %1071 = vadd.xlane.f32.xlu0 %v1070_v54 }
 0x35a   :  { %v786_v59 = vpop.xlane.xlu1 %785 }
 0x35b   :  { %v780_v62 = vpop.xlane.xlu0 %779  ;;  %1601 = vrcp.f32 %v786_v59 }
 0x35c   :  { %1603 = vrcp.f32 %v780_v62 }
 0x35e   :  { %v789_v63 = vpop.xlane.xlu1 %788 }
 0x35f   :  { %1605 = vrcp.f32 %v789_v63  ;;  %v783_v1 = vpop.xlane.xlu0 %782 }
 0x360   :  { %1607 = vrcp.f32 %v783_v1 }
 0x363   :  { %v795_v4 = vpop.xlane.xlu1 %794  ;;  %v792_v5 = vpop.xlane.xlu0 %791 }
 0x364   :  { %1609 = vrcp.f32 %v795_v4 }
 0x365   :  { %1611 = vrcp.f32 %v792_v5  ;;  %v1602_v7 = vpop.eup %1601 }
 0x366   :  { %v1604_v16 = vpop.eup %1603  ;;  %v812_v22 = vmul.f32 %v1602_v7, %v771_v57 }
 0x367   :  { %v801_v9 = vpop.xlane.xlu1 %800  ;;  %v798_v11 = vpop.xlane.xlu0 %797  ;;  %v810_v20 = vmul.f32 %v1604_v16, %v769_v61 }
 0x368   :  { %1613 = vrcp.f32 %v801_v9 }
 0x369   :  { %v1606_v17 = vpop.eup %1605  ;;  %1615 = vrcp.f32 %v798_v11 }
 0x36a   :  { %v1608_v18 = vpop.eup %1607  ;;  %v813_v19 = vmul.f32 %v1606_v17, %v772_v3 }
 0x36b   :  { %v811_v21 = vmul.f32 %v1608_v18, %v770_v6 }
 0x36c   :  { %v819_v25 = vpack.c.bf16 %v813_v19, %v812_v22 }
 0x36d   :  { %v818_v23 = vpack.c.bf16 %v811_v21, %v810_v20 }
 0x36e   :  { %v1610_v24 = vpop.eup %1609 }
 0x36f   :  { %v1612_v26 = vpop.eup %1611  ;;  %1455 = vmatprep.mubr.msk.bf16.mxu0 %vm777_vm3, %v818_v23  ;;  %v815_v27 = vmul.f32 %v1610_v24, %v774_v12 }
 0x370   :  { %1456 = vmatmul.mubr.msk.bf16.vlgmr.msra.gmra.mrb[16].mxu0 %vm777_vm3, %v819_v25  ;;  %v814_v61 = vmul.f32 %v1612_v26, %v773_v13 }
 0x371   :  { %1480 = vmatpush3.bf16.msra.mxu0 %v1831_v60 }
 0x372   :  { %v1614_v56 = vpop.eup %1613  ;;  %1481 = vmatprep.subr.bf16.mxu0 %v1829_v58  ;;  %v820_v55 = vpack.c.bf16 %v815_v27, %v814_v61 }
 0x373   :  { %v1616_v57 = vpop.eup %1615  ;;  %v817_v3 = vmul.f32 %v1614_v56, %v776_v14 }
 0x374   :  { %1459 = vmatprep.mubr.msk.bf16.mxu0 %vm777_vm3, %v820_v55  ;;  %v816_v6 = vmul.f32 %v1616_v57, %v775_v15 }
 0x375   :  { %1482 = vmatpush3.bf16.msra.mxu0 %v1829_v58 }
 0x376   :  { %1483 = vmatprep.subr.bf16.mxu0 %v1836_v2  ;;  %v821_v10 = vpack.c.bf16 %v817_v3, %v816_v6 }
 0x378   :  { %1460 = vmatmul.mubr.msk.bf16.gmra.mrb[20].mxu0 %vm777_vm3, %v821_v10 }
 0x379   :  { %1484 = vmatpush3.bf16.msra.mxu0 %v1836_v2 }
 0x37a   :  { %1485 = vmatprep.subr.bf16.mxu0 %v1834_v0 }
 0x37b   :  { %v1057_v60 = vpop.xlane.xlu1 %1056  ;;  %v1054_v12 = vpop.xlane.xlu0 %1053 }
 0x37c   :  { %1617 = vrcp.f32 %v1057_v60 }
 0x37d   :  { %1619 = vrcp.f32 %v1054_v12  ;;  %1486 = vmatpush3.bf16.msra.mxu0 %v1834_v0 }
 0x37f   :  { %v1063_v13 = vpop.xlane.xlu1 %1062  ;;  %v1060_v8 = vpop.xlane.xlu0 %1059 }
 0x380   :  { %1621 = vrcp.f32 %v1063_v13 }
 0x381   :  { %1623 = vrcp.f32 %v1060_v8 }
 0x383   :  { %v1069_v58 = vpop.xlane.xlu1 %1068  ;;  %v1066_v14 = vpop.xlane.xlu0 %1065 }
 0x384   :  { %1625 = vrcp.f32 %v1069_v58 }
 0x385   :  { %1627 = vrcp.f32 %v1066_v14 }
 0x386   :  { %v1618_v15 = vpop.eup %1617 }
 0x387   :  { %v1620_v28 = vpop.eup %1619  ;;  %v1075_v29 = vpop.xlane.xlu1 %1074  ;;  %v1085_v30 = vmul.f32 %v1618_v15, %v1045_v37 }
 0x388   :  { %v1072_v2 = vpop.xlane.xlu0 %1071  ;;  %1629 = vrcp.f32 %v1075_v29  ;;  %v1084_v31 = vmul.f32 %v1620_v28, %v1044_v38 }
 0x389   :  { %1631 = vrcp.f32 %v1072_v2 }
 0x38a   :  { %v1622_v0 = vpop.eup %1621  ;;  %v1092_v32 = vpack.c.bf16 %v1085_v30, %v1084_v31 }
 0x38b   :  { %v1624_v33 = vpop.eup %1623  ;;  %v1087_v34 = vmul.f32 %v1622_v0, %v1047_v41 }
 0x38c   :  { %v1086_v39 = vmul.f32 %v1624_v33, %v1046_v42  ;;  %1487 = vmatprep.mubr.msk.bf16.mxu0 %vm777_vm3, %v1092_v32 }
 0x38e   :  { %v1626_v40 = vpop.eup %1625  ;;  %v1093_v44 = vpack.c.bf16 %v1087_v34, %v1086_v39 }
 0x38f   :  { %v1628_v45 = vpop.eup %1627  ;;  %v1089_v37 = vmul.f32 %v1626_v40, %v1049_v47  ;;  %v1241_v47 = vld [vmem:[%s2038_s6] ss:$0 sm:$0xff] }
 0x390   :  { %1488 = vmatmul.mubr.msk.bf16.vlgmr.msra.gmra.mrb[24].mxu0 %vm777_vm3, %v1093_v44  ;;  %v1088_v36 = vmul.f32 %v1628_v45, %v1048_v48 }
 0x392   :  { %v1630_v38 = vpop.eup %1629  ;;  %v1094_v49 = vpack.c.bf16 %v1089_v37, %v1088_v36 }
 0x393   :  { %v1632_v50 = vpop.eup %1631  ;;  %v1091_v35 = vmul.f32 %v1630_v38, %v1051_v51 }
 0x394   :  { %1491 = vmatprep.mubr.msk.bf16.mxu0 %vm777_vm3, %v1094_v49  ;;  %v1090_v41 = vmul.f32 %v1632_v50, %v1050_v52 }
 0x396   :  { %v1095_v42 = vpack.c.bf16 %v1091_v35, %v1090_v41 }
 0x398   :  { %1492 = vmatmul.mubr.msk.bf16.gmra.mrb[28].mxu0 %vm777_vm3, %v1095_v42 }
 0x443   :  { %v1457_v46 = vpop.f32.mrb[16].mxu0 }
 0x444   :  { %v1495_v48 = vadd.f32 %v1457_v46, %v1241_v47  ;;  %v868_v53 = vpop.f32.mrb[17].mxu0 }
 0x445   :  { %v1496_v54 = vadd.f32 %v1241_v47, %v868_v53  ;;  %v1458_v59 = vpop.f32.mrb[18].mxu0 }
 0x446   :  { %v909_v62 = vmax.f32 %v1495_v48, 0.0  ;;  %v1497_v63 = vadd.f32 %v1458_v59, %v1241_v47  ;;  %v871_v51 = vpop.f32.mrb[19].mxu0 }
 0x447   :  { %v907_v1 = vmax.f32 %v1496_v54, 0.0  ;;  %v1498_v4 = vadd.f32 %v1241_v47, %v871_v51 }
 0x448   :  { %917 = vst.msk [vmem:[%s2039_s7 + $0x10] sm:$0xff] %vm277_vm2, %v909_v62  ;;  %v910_v43 = vmax.f32 %v1497_v63, 0.0 }
 0x449   :  { %915 = vst.msk [vmem:[%s2039_s7] sm:$0xff] %vm277_vm2, %v907_v1  ;;  %v908_v52 = vmax.f32 %v1498_v4, 0.0 }
 0x44a   :  { %918 = vst.msk [vmem:[%s2039_s7 + $0x18] sm:$0xff] %vm277_vm2, %v910_v43 }
 0x44b   :  { %916 = vst.msk [vmem:[%s2039_s7 + $0x8] sm:$0xff] %vm277_vm2, %v908_v52  ;;  %v1461_v5 = vpop.f32.mrb[20].mxu0 }
 0x44c   :  { %v1499_v7 = vadd.f32 %v1461_v5, %v1241_v47  ;;  %v884_v9 = vpop.f32.mrb[21].mxu0 }
 0x44d   :  { %v1500_v11 = vadd.f32 %v1241_v47, %v884_v9  ;;  %v1462_v16 = vpop.f32.mrb[22].mxu0 }
 0x44e   :  { %v913_v17 = vmax.f32 %v1499_v7, 0.0  ;;  %v1501_v18 = vadd.f32 %v1462_v16, %v1241_v47  ;;  %v887_v19 = vpop.f32.mrb[23].mxu0 }
 0x44f   :  { %v911_v20 = vmax.f32 %v1500_v11, 0.0  ;;  %v1502_v21 = vadd.f32 %v1241_v47, %v887_v19 }
 0x450   :  { %921 = vst.msk [vmem:[%s2039_s7 + $0x30] sm:$0xff] %vm277_vm2, %v913_v17  ;;  %v914_v22 = vmax.f32 %v1501_v18, 0.0 }
 0x451   :  { %919 = vst.msk [vmem:[%s2039_s7 + $0x20] sm:$0xff] %vm277_vm2, %v911_v20  ;;  %v912_v23 = vmax.f32 %v1502_v21, 0.0 }
 0x452   :  { %922 = vst.msk [vmem:[%s2039_s7 + $0x38] sm:$0xff] %vm277_vm2, %v914_v22 }
 0x453   :  { %920 = vst.msk [vmem:[%s2039_s7 + $0x28] sm:$0xff] %vm277_vm2, %v912_v23 }
 0x463   :  { %v1489_v24 = vpop.f32.mrb[24].mxu0 }
 0x464   :  { %v1503_v25 = vadd.f32 %v1489_v24, %v1241_v47  ;;  %v1142_v26 = vpop.f32.mrb[25].mxu0 }
 0x465   :  { %v1504_v27 = vadd.f32 %v1241_v47, %v1142_v26  ;;  %v1490_v61 = vpop.f32.mrb[26].mxu0 }
 0x466   :  { %v1183_v56 = vmax.f32 %v1503_v25, 0.0  ;;  %v1505_v55 = vadd.f32 %v1490_v61, %v1241_v47  ;;  %v1145_v57 = vpop.f32.mrb[27].mxu0 }
 0x467   :  { %v1181_v3 = vmax.f32 %v1504_v27, 0.0  ;;  %v1506_v6 = vadd.f32 %v1241_v47, %v1145_v57 }
 0x468   :  { %1191 = vst.msk [vmem:[%s2039_s7 + $0x50] sm:$0xff] %vm277_vm2, %v1183_v56  ;;  %v1184_v10 = vmax.f32 %v1505_v55, 0.0 }
 0x469   :  { %1189 = vst.msk [vmem:[%s2039_s7 + $0x40] sm:$0xff] %vm277_vm2, %v1181_v3  ;;  %v1182_v60 = vmax.f32 %v1506_v6, 0.0 }
 0x46a   :  { %1192 = vst.msk [vmem:[%s2039_s7 + $0x58] sm:$0xff] %vm277_vm2, %v1184_v10 }
 0x46b   :  { %1190 = vst.msk [vmem:[%s2039_s7 + $0x48] sm:$0xff] %vm277_vm2, %v1182_v60  ;;  %v1493_v12 = vpop.f32.mrb[28].mxu0 }
 0x46c   :  { %v1507_v13 = vadd.f32 %v1493_v12, %v1241_v47  ;;  %v1158_v8 = vpop.f32.mrb[29].mxu0 }
 0x46d   :  { %v1508_v58 = vadd.f32 %v1241_v47, %v1158_v8  ;;  %v1494_v14 = vpop.f32.mrb[30].mxu0 }
 0x46e   :  { %v1187_v15 = vmax.f32 %v1507_v13, 0.0  ;;  %v1509_v28 = vadd.f32 %v1494_v14, %v1241_v47  ;;  %v1161_v29 = vpop.f32.mrb[31].mxu0 }
 0x46f   :  { %v1185_v2 = vmax.f32 %v1508_v58, 0.0  ;;  %v1510_v30 = vadd.f32 %v1241_v47, %v1161_v29 }
 0x470   :  { %1195 = vst.msk [vmem:[%s2039_s7 + $0x70] sm:$0xff] %vm277_vm2, %v1187_v15  ;;  %v1188_v31 = vmax.f32 %v1509_v28, 0.0 }
 0x471   :  { %1193 = vst.msk [vmem:[%s2039_s7 + $0x60] sm:$0xff] %vm277_vm2, %v1185_v2  ;;  %v1186_v0 = vmax.f32 %v1510_v30, 0.0 }
 0x472   :  { %1196 = vst.msk [vmem:[%s2039_s7 + $0x78] sm:$0xff] %vm277_vm2, %v1188_v31 }
 0x473   :  { %1194 = vst.msk [vmem:[%s2039_s7 + $0x68] sm:$0xff] %vm277_vm2, %v1186_v0 }

</bundles_post_ra>
